<compile_context>
chip_gen: v7x
topology: tpu7x:2x2x1
jax: 0.10.0
libtpu: 0.0.40
codegen_flags: <defaults>
</compile_context>

<pallas_src>
import functools

import jax
import jax.numpy as jnp
from jax.experimental import pallas as pl
from jax.experimental.pallas import tpu as pltpu

EPS = 1e-5


def mha_kernel(x_ref, wqkv_ref, bqkv_ref, wo_ref, bo_ref, out_ref, ctx_ref,
               *, num_heads, batch_block, seq_len, matmul_dtype):
    E = x_ref.shape[-1]
    H = num_heads
    Dh = E // H
    S = seq_len
    Bb = batch_block

    # ---- (Bb*S, E) slab of the input ----
    x = x_ref[...].astype(jnp.float32)

    # ---- LayerNorm over last dim (F.layer_norm with no weight/bias), f32 stats ----
    mean = jnp.mean(x, axis=-1, keepdims=True)
    var = jnp.mean((x - mean) ** 2, axis=-1, keepdims=True)
    xn = (x - mean) * jax.lax.rsqrt(var + EPS)

    # ---- single fused QKV projection ----
    # Weights are pre-transposed and pre-fused on the host:
    #   columns [0,E)   -> q (outer q_proj + attn in_proj, scaled by 1/sqrt(Dh))
    #   columns [E,2E)  -> k (outer k_proj + attn in_proj)
    #   columns [2E,3E) -> v (outer v_proj + attn in_proj)
    qkv = (jnp.dot(xn.astype(matmul_dtype), wqkv_ref[...],
                   preferred_element_type=jnp.float32)
           + bqkv_ref[0])                                  # (Bb*S, 3E), f32

    # ---- causal mask, built once per grid step ----
    row = jax.lax.broadcasted_iota(jnp.int32, (S, S), 0)
    col = jax.lax.broadcasted_iota(jnp.int32, (S, S), 1)
    allowed = (col <= row)[None]                           # (1, S, S)
    big_neg = jnp.float32(-1e30)

    # ---- attention: static loop over heads, batched over the batch block ----
    for h in range(H):
        q_h = qkv[:, h * Dh:(h + 1) * Dh].reshape(Bb, S, Dh).astype(matmul_dtype)
        k_h = qkv[:, E + h * Dh:E + (h + 1) * Dh].reshape(Bb, S, Dh).astype(matmul_dtype)
        v_h = qkv[:, 2 * E + h * Dh:2 * E + (h + 1) * Dh].reshape(Bb, S, Dh).astype(matmul_dtype)

        # scale already folded into the fused q weight/bias
        scores = jnp.einsum('bqd,bkd->bqk', q_h, k_h,
                            preferred_element_type=jnp.float32)      # (Bb, S, S)
        scores = jnp.where(allowed, scores, big_neg)
        m = jnp.max(scores, axis=-1, keepdims=True)
        p = jnp.exp(scores - m)                    # masked entries underflow to 0
        denom = jnp.sum(p, axis=-1, keepdims=True)
        p = p * pl.reciprocal(denom, approx=True)  # EUP slot, frees VPU bundles

        ctx_h = jnp.einsum('bqk,bkd->bqd', p.astype(matmul_dtype), v_h,
                           preferred_element_type=jnp.float32)       # (Bb, S, Dh)
        ctx_ref[:, h * Dh:(h + 1) * Dh] = ctx_h.reshape(Bb * S, Dh)

    # ---- output projection of nn.MultiheadAttention (pre-transposed weight) ----
    out = (jnp.dot(ctx_ref[...].astype(matmul_dtype), wo_ref[...],
                   preferred_element_type=jnp.float32)
           + bo_ref[0])
    out_ref[...] = out.astype(out_ref.dtype)


def _fuse_params(params, num_heads, matmul_dtype):
    """Host-side param prep: fuse stacked Linears, fold scale, pre-transpose."""
    (wq_o, bq_o, wk_o, bk_o, wv_o, bv_o,
     wq_i, bq_i, wk_i, bk_i, wv_i, bv_i, wo, bo) = params
    E = wq_o.shape[0]
    head_dim = E // num_heads
    scale = 1.0 / float(head_dim) ** 0.5

    def fuse(w_outer, b_outer, w_inner, b_inner):
        # Linear(Linear(x)):  (x @ Wo^T + bo) @ Wi^T + bi
        #                   = x @ (Wi @ Wo)^T + (Wi @ bo + bi)
        return w_inner @ w_outer, w_inner @ b_outer + b_inner

    wq, bq = fuse(wq_o, bq_o, wq_i, bq_i)
    wk, bk = fuse(wk_o, bk_o, wk_i, bk_i)
    wv, bv = fuse(wv_o, bv_o, wv_i, bv_i)
    wq = wq * scale      # fold 1/sqrt(Dh) into the q stream
    bq = bq * scale

    w_qkv_t = jnp.concatenate([wq, wk, wv], axis=0).T     # (E, 3E), pre-transposed
    b_qkv = jnp.concatenate([bq, bk, bv]).reshape(1, 3 * E)
    wo_t = wo.T                                           # (E, E), pre-transposed
    bo2 = bo.reshape(1, E)

    if matmul_dtype != jnp.float32:
        w_qkv_t = w_qkv_t.astype(matmul_dtype)
        wo_t = wo_t.astype(matmul_dtype)
    return w_qkv_t, b_qkv, wo_t, bo2


def _pick_batch_block(B, S, target_rows=256):
    """Largest batch block whose slab stays modest while keeping >=2 grid steps."""
    divisors = [d for d in range(1, B + 1) if B % d == 0]
    cands = [d for d in divisors if d * S <= target_rows and (B // d >= 2 or B == 1)]
    if not cands:
        cands = [d for d in divisors if (B // d >= 2 or B == 1)] or [1]
    return max(cands)


def multihead_attention(x, params, num_heads, *,
                        matmul_dtype=jnp.bfloat16, batch_block=None):
    B, S, E = x.shape
    assert E % num_heads == 0
    w_qkv_t, b_qkv, wo_t, bo = _fuse_params(params, num_heads, matmul_dtype)

    if batch_block is None:
        batch_block = _pick_batch_block(B, S)
    assert B % batch_block == 0
    rows = batch_block * S                                 # slab height per grid step

    kernel = functools.partial(
        mha_kernel, num_heads=num_heads, batch_block=batch_block,
        seq_len=S, matmul_dtype=matmul_dtype)

    out2d = pl.pallas_call(
        kernel,
        out_shape=jax.ShapeDtypeStruct((B * S, E), x.dtype),
        grid=(B // batch_block,),
        in_specs=[
            pl.BlockSpec((rows, E), lambda b: (b, 0)),          # x slab
            pl.BlockSpec((E, 3 * E), lambda b: (0, 0)),         # fused QKV weight^T
            pl.BlockSpec((1, 3 * E), lambda b: (0, 0)),         # fused QKV bias
            pl.BlockSpec((E, E), lambda b: (0, 0)),             # out_proj weight^T
            pl.BlockSpec((1, E), lambda b: (0, 0)),             # out_proj bias
        ],
        out_specs=pl.BlockSpec((rows, E), lambda b: (b, 0)),
        scratch_shapes=[pltpu.VMEM((rows, E), jnp.float32)],    # per-slab context
        compiler_params=pltpu.CompilerParams(
            dimension_semantics=("parallel",)),
    )(x.reshape(B * S, E), w_qkv_t, b_qkv, wo_t, bo)
    return out2d.reshape(B, S, E)


def reference(x, params, num_heads):
    """Pure-JAX reference with identical semantics (for a sanity check)."""
    (wq_o, bq_o, wk_o, bk_o, wv_o, bv_o,
     wq_i, bq_i, wk_i, bk_i, wv_i, bv_i, wo, bo) = params
    B, S, E = x.shape
    hd = E // num_heads
    mean = jnp.mean(x, axis=-1, keepdims=True)
    var = jnp.mean((x - mean) ** 2, axis=-1, keepdims=True)
    xn = (x - mean) / jnp.sqrt(var + EPS)
    lin = lambda a, w, b: a @ w.T + b
    q = lin(lin(xn, wq_o, bq_o), wq_i, bq_i)
    k = lin(lin(xn, wk_o, bk_o), wk_i, bk_i)
    v = lin(lin(xn, wv_o, bv_o), wv_i, bv_i)
    qh = q.reshape(B, S, num_heads, hd).transpose(0, 2, 1, 3)
    kh = k.reshape(B, S, num_heads, hd).transpose(0, 2, 1, 3)
    vh = v.reshape(B, S, num_heads, hd).transpose(0, 2, 1, 3)
    scores = jnp.einsum('bhqd,bhkd->bhqk', qh, kh) / jnp.sqrt(hd)
    mask = jnp.tril(jnp.ones((S, S), dtype=bool))
    scores = jnp.where(mask, scores, -1e30)
    p = jax.nn.softmax(scores, axis=-1)
    ctx = jnp.einsum('bhqk,bhkd->bhqd', p, vh).transpose(0, 2, 1, 3).reshape(B, S, E)
    return ctx @ wo.T + bo


def init_params(key, embed_dim):
    ks = jax.random.split(key, 14)
    E = embed_dim
    scale = 0.02

    def w(k):
        return jax.random.normal(k, (E, E), jnp.float32) * scale

    def bvec(k):
        return jax.random.normal(k, (E,), jnp.float32) * scale

    return (w(ks[0]), bvec(ks[1]),    # q_proj (outer)
            w(ks[2]), bvec(ks[3]),    # k_proj (outer)
            w(ks[4]), bvec(ks[5]),    # v_proj (outer)
            w(ks[6]), bvec(ks[7]),    # attn in_proj for q
            w(ks[8]), bvec(ks[9]),    # attn in_proj for k
            w(ks[10]), bvec(ks[11]),  # attn in_proj for v
            w(ks[12]), bvec(ks[13]))  # attn out_proj


if __name__ == "__main__":
    B, S, E, H = 2, 8, 32, 4   # batch, seq, embedding_dim, num_heads
    key = jax.random.PRNGKey(0)
    kx, kp = jax.random.split(key)
    x = jax.random.normal(kx, (B, S, E), jnp.float32)
    params = init_params(kp, E)

    ref = reference(x, params, H)

    # f32-matmul path: tight-tolerance correctness check against the reference.
    out_f32 = jax.block_until_ready(
        multihead_attention(x, params, H, matmul_dtype=jnp.float32))
    assert out_f32.shape == (B, S, E)
    assert jnp.allclose(out_f32, ref, atol=1e-4, rtol=1e-4), "f32 mismatch vs reference"

    # bf16-matmul path (default perf config, f32 accumulation): relaxed tolerance.
    out_bf16 = jax.block_until_ready(multihead_attention(x, params, H))
    assert out_bf16.shape == (B, S, E)
    assert jnp.allclose(out_bf16, ref, atol=2e-2, rtol=2e-2), "bf16 mismatch vs reference"

    # TODO(synk): for long sequences, switch the attention inner loop to an
    # online-softmax (flash-style) tiling instead of materializing (S, S) scores.
    print("KERNEL_OK")
</pallas_src>

<mosaic_0001>
module attributes {stable_mosaic.version = 11 : i64} {
  func.func @mha_kernel(%arg0: i32, %arg1: memref<8x32xf32, #tpu.memory_space<vmem>>, %arg2: memref<32x96xf32, #tpu.memory_space<vmem>>, %arg3: memref<1x96xf32, #tpu.memory_space<vmem>>, %arg4: memref<32x32xf32, #tpu.memory_space<vmem>>, %arg5: memref<1x32xf32, #tpu.memory_space<vmem>>, %arg6: memref<8x32xf32, #tpu.memory_space<vmem>>, %arg7: memref<8x32xf32, #tpu.memory_space<vmem>>) attributes {dimension_semantics = [#tpu.dimension_semantics<parallel>], iteration_bounds = array<i64: 2>, scalar_prefetch = 0 : i64, scratch_operands = 1 : i64, tpu.core_type = #tpu.core_type<tc>, window_params = [{transform_indices = @transform_0, window_bounds = array<i64: 8, 32>}, {pipeline_mode = #tpu.pipeline_mode<synchronous>, transform_indices = @transform_1, window_bounds = array<i64: 32, 96>}, {pipeline_mode = #tpu.pipeline_mode<synchronous>, transform_indices = @transform_2, window_bounds = array<i64: 1, 96>}, {pipeline_mode = #tpu.pipeline_mode<synchronous>, transform_indices = @transform_3, window_bounds = array<i64: 32, 32>}, {pipeline_mode = #tpu.pipeline_mode<synchronous>, transform_indices = @transform_4, window_bounds = array<i64: 1, 32>}, {transform_indices = @transform_5, window_bounds = array<i64: 8, 32>}]} {
    %c0 = arith.constant 0 : index
    %c0_0 = arith.constant 0 : index
    %0 = vector.load %arg1[%c0, %c0_0] : memref<8x32xf32, #tpu.memory_space<vmem>>, vector<8x32xf32>
    %cst = arith.constant dense<0.000000e+00> : vector<8xf32>
    %1 = vector.multi_reduction <add>, %0, %cst [1] : vector<8x32xf32> to vector<8xf32>
    %2 = vector.shape_cast %1 : vector<8xf32> to vector<8x1xf32>
    %cst_1 = arith.constant 3.200000e+01 : f32
    %3 = vector.broadcast %cst_1 : f32 to vector<8x1xf32>
    %4 = arith.divf %2, %3 : vector<8x1xf32>
    %5 = vector.broadcast %4 : vector<8x1xf32> to vector<8x32xf32>
    %6 = arith.subf %0, %5 : vector<8x32xf32>
    %7 = arith.mulf %6, %6 : vector<8x32xf32>
    %cst_2 = arith.constant dense<0.000000e+00> : vector<8xf32>
    %8 = vector.multi_reduction <add>, %7, %cst_2 [1] : vector<8x32xf32> to vector<8xf32>
    %9 = vector.shape_cast %8 : vector<8xf32> to vector<8x1xf32>
    %cst_3 = arith.constant 3.200000e+01 : f32
    %10 = vector.broadcast %cst_3 : f32 to vector<8x1xf32>
    %11 = arith.divf %9, %10 : vector<8x1xf32>
    %12 = vector.broadcast %4 : vector<8x1xf32> to vector<8x32xf32>
    %13 = arith.subf %0, %12 : vector<8x32xf32>
    %cst_4 = arith.constant 9.99999974E-6 : f32
    %14 = vector.broadcast %cst_4 : f32 to vector<8x1xf32>
    %15 = arith.addf %11, %14 : vector<8x1xf32>
    %16 = math.rsqrt %15 : vector<8x1xf32>
    %17 = vector.broadcast %16 : vector<8x1xf32> to vector<8x32xf32>
    %18 = arith.mulf %13, %17 : vector<8x32xf32>
    %c0_5 = arith.constant 0 : index
    %c0_6 = arith.constant 0 : index
    %19 = vector.load %arg2[%c0_5, %c0_6] : memref<32x96xf32, #tpu.memory_space<vmem>>, vector<32x96xf32>
    %cst_7 = arith.constant dense<0.000000e+00> : vector<8x96xf32>
    %20 = tpu.matmul %18, %19, %cst_7 {dimension_numbers = #tpu.dot_dimension_numbers<[1], [0], [0], [1], [0, 0, 1, 1], [], []>} : vector<8x32xf32>, vector<32x96xf32>, vector<8x96xf32> -> vector<8x96xf32>
    %c0_8 = arith.constant 0 : index
    %c0_9 = arith.constant 0 : index
    %21 = vector.load %arg3[%c0_8, %c0_9] : memref<1x96xf32, #tpu.memory_space<vmem>>, vector<1x96xf32>
    %22 = vector.shape_cast %21 : vector<1x96xf32> to vector<96xf32>
    %23 = vector.shape_cast %22 : vector<96xf32> to vector<1x96xf32>
    %24 = vector.broadcast %23 : vector<1x96xf32> to vector<8x96xf32>
    %25 = arith.addf %20, %24 : vector<8x96xf32>
    %26 = tpu.iota {dimensions = array<i32: 0>} : vector<8x8xi32>
    %27 = tpu.iota {dimensions = array<i32: 1>} : vector<8x8xi32>
    %28 = arith.cmpi sle, %27, %26 : vector<8x8xi32>
    %29 = vector.shape_cast %28 : vector<8x8xi1> to vector<1x8x8xi1>
    %30 = vector.extract_strided_slice %25 {offsets = [0, 0], sizes = [8, 8], strides = [1, 1]} : vector<8x96xf32> to vector<8x8xf32>
    %31 = vector.shape_cast %30 : vector<8x8xf32> to vector<1x8x8xf32>
    %32 = vector.extract_strided_slice %25 {offsets = [0, 32], sizes = [8, 8], strides = [1, 1]} : vector<8x96xf32> to vector<8x8xf32>
    %33 = vector.shape_cast %32 : vector<8x8xf32> to vector<1x8x8xf32>
    %34 = vector.extract_strided_slice %25 {offsets = [0, 64], sizes = [8, 8], strides = [1, 1]} : vector<8x96xf32> to vector<8x8xf32>
    %35 = vector.shape_cast %34 : vector<8x8xf32> to vector<1x8x8xf32>
    "tpu.trace_start"() <{level = 10 : i32, message = "bqd,bkd->bqk"}> : () -> ()
    %cst_10 = arith.constant dense<0.000000e+00> : vector<1x8x8xf32>
    %36 = tpu.matmul %31, %33, %cst_10 {dimension_numbers = #tpu.dot_dimension_numbers<[2], [2], [1], [1], [0, 0, 0, 1, 1, 1], [0], [0]>} : vector<1x8x8xf32>, vector<1x8x8xf32>, vector<1x8x8xf32> -> vector<1x8x8xf32>
    %cst_11 = arith.constant -1.000000e+30 : f32
    "tpu.trace_stop"() : () -> ()
    %37 = vector.broadcast %cst_11 : f32 to vector<1x8x8xf32>
    %38 = arith.select %29, %36, %37 : vector<1x8x8xi1>, vector<1x8x8xf32>
    %cst_12 = arith.constant dense<0xFF800000> : vector<1x8xf32>
    %39 = vector.multi_reduction <maximumf>, %38, %cst_12 [2] : vector<1x8x8xf32> to vector<1x8xf32>
    %40 = vector.shape_cast %39 : vector<1x8xf32> to vector<1x8x1xf32>
    %41 = vector.broadcast %40 : vector<1x8x1xf32> to vector<1x8x8xf32>
    %42 = arith.subf %38, %41 : vector<1x8x8xf32>
    %43 = math.exp %42 : vector<1x8x8xf32>
    %cst_13 = arith.constant dense<0.000000e+00> : vector<1x8xf32>
    %44 = vector.multi_reduction <add>, %43, %cst_13 [2] : vector<1x8x8xf32> to vector<1x8xf32>
    %45 = vector.shape_cast %44 : vector<1x8xf32> to vector<1x8x1xf32>
    %46 = tpu.reciprocal %45 {approx = true} : vector<1x8x1xf32> -> vector<1x8x1xf32>
    %47 = vector.broadcast %46 : vector<1x8x1xf32> to vector<1x8x8xf32>
    %48 = arith.mulf %43, %47 : vector<1x8x8xf32>
    "tpu.trace_start"() <{level = 10 : i32, message = "bqk,bkd->bqd"}> : () -> ()
    %cst_14 = arith.constant dense<0.000000e+00> : vector<1x8x8xf32>
    %49 = tpu.matmul %48, %35, %cst_14 {dimension_numbers = #tpu.dot_dimension_numbers<[2], [1], [1], [2], [0, 0, 0, 1, 1, 2], [0], [0]>} : vector<1x8x8xf32>, vector<1x8x8xf32>, vector<1x8x8xf32> -> vector<1x8x8xf32>
    "tpu.trace_stop"() : () -> ()
    %50 = vector.shape_cast %49 : vector<1x8x8xf32> to vector<8x8xf32>
    %c0_15 = arith.constant 0 : index
    %c0_16 = arith.constant 0 : index
    %51 = vector.load %arg7[%c0_15, %c0_16] : memref<8x32xf32, #tpu.memory_space<vmem>>, vector<8x8xf32>
    tpu.vector_store %arg7[%c0_15, %c0_16], %50 {strides = array<i32>} : memref<8x32xf32, #tpu.memory_space<vmem>>, vector<8x8xf32>,
    %52 = vector.extract_strided_slice %25 {offsets = [0, 8], sizes = [8, 8], strides = [1, 1]} : vector<8x96xf32> to vector<8x8xf32>
    %53 = vector.shape_cast %52 : vector<8x8xf32> to vector<1x8x8xf32>
    %54 = vector.extract_strided_slice %25 {offsets = [0, 40], sizes = [8, 8], strides = [1, 1]} : vector<8x96xf32> to vector<8x8xf32>
    %55 = vector.shape_cast %54 : vector<8x8xf32> to vector<1x8x8xf32>
    %56 = vector.extract_strided_slice %25 {offsets = [0, 72], sizes = [8, 8], strides = [1, 1]} : vector<8x96xf32> to vector<8x8xf32>
    %57 = vector.shape_cast %56 : vector<8x8xf32> to vector<1x8x8xf32>
    "tpu.trace_start"() <{level = 10 : i32, message = "bqd,bkd->bqk"}> : () -> ()
    %cst_17 = arith.constant dense<0.000000e+00> : vector<1x8x8xf32>
    %58 = tpu.matmul %53, %55, %cst_17 {dimension_numbers = #tpu.dot_dimension_numbers<[2], [2], [1], [1], [0, 0, 0, 1, 1, 1], [0], [0]>} : vector<1x8x8xf32>, vector<1x8x8xf32>, vector<1x8x8xf32> -> vector<1x8x8xf32>
    %cst_18 = arith.constant -1.000000e+30 : f32
    "tpu.trace_stop"() : () -> ()
    %59 = vector.broadcast %cst_18 : f32 to vector<1x8x8xf32>
    %60 = arith.select %29, %58, %59 : vector<1x8x8xi1>, vector<1x8x8xf32>
    %cst_19 = arith.constant dense<0xFF800000> : vector<1x8xf32>
    %61 = vector.multi_reduction <maximumf>, %60, %cst_19 [2] : vector<1x8x8xf32> to vector<1x8xf32>
    %62 = vector.shape_cast %61 : vector<1x8xf32> to vector<1x8x1xf32>
    %63 = vector.broadcast %62 : vector<1x8x1xf32> to vector<1x8x8xf32>
    %64 = arith.subf %60, %63 : vector<1x8x8xf32>
    %65 = math.exp %64 : vector<1x8x8xf32>
    %cst_20 = arith.constant dense<0.000000e+00> : vector<1x8xf32>
    %66 = vector.multi_reduction <add>, %65, %cst_20 [2] : vector<1x8x8xf32> to vector<1x8xf32>
    %67 = vector.shape_cast %66 : vector<1x8xf32> to vector<1x8x1xf32>
    %68 = tpu.reciprocal %67 {approx = true} : vector<1x8x1xf32> -> vector<1x8x1xf32>
    %69 = vector.broadcast %68 : vector<1x8x1xf32> to vector<1x8x8xf32>
    %70 = arith.mulf %65, %69 : vector<1x8x8xf32>
    "tpu.trace_start"() <{level = 10 : i32, message = "bqk,bkd->bqd"}> : () -> ()
    %cst_21 = arith.constant dense<0.000000e+00> : vector<1x8x8xf32>
    %71 = tpu.matmul %70, %57, %cst_21 {dimension_numbers = #tpu.dot_dimension_numbers<[2], [1], [1], [2], [0, 0, 0, 1, 1, 2], [0], [0]>} : vector<1x8x8xf32>, vector<1x8x8xf32>, vector<1x8x8xf32> -> vector<1x8x8xf32>
    "tpu.trace_stop"() : () -> ()
    %72 = vector.shape_cast %71 : vector<1x8x8xf32> to vector<8x8xf32>
    %c0_22 = arith.constant 0 : index
    %c8 = arith.constant 8 : index
    %73 = vector.load %arg7[%c0_22, %c8] : memref<8x32xf32, #tpu.memory_space<vmem>>, vector<8x8xf32>
    tpu.vector_store %arg7[%c0_22, %c8], %72 {strides = array<i32>} : memref<8x32xf32, #tpu.memory_space<vmem>>, vector<8x8xf32>,
    %74 = vector.extract_strided_slice %25 {offsets = [0, 16], sizes = [8, 8], strides = [1, 1]} : vector<8x96xf32> to vector<8x8xf32>
    %75 = vector.shape_cast %74 : vector<8x8xf32> to vector<1x8x8xf32>
    %76 = vector.extract_strided_slice %25 {offsets = [0, 48], sizes = [8, 8], strides = [1, 1]} : vector<8x96xf32> to vector<8x8xf32>
    %77 = vector.shape_cast %76 : vector<8x8xf32> to vector<1x8x8xf32>
    %78 = vector.extract_strided_slice %25 {offsets = [0, 80], sizes = [8, 8], strides = [1, 1]} : vector<8x96xf32> to vector<8x8xf32>
    %79 = vector.shape_cast %78 : vector<8x8xf32> to vector<1x8x8xf32>
    "tpu.trace_start"() <{level = 10 : i32, message = "bqd,bkd->bqk"}> : () -> ()
    %cst_23 = arith.constant dense<0.000000e+00> : vector<1x8x8xf32>
    %80 = tpu.matmul %75, %77, %cst_23 {dimension_numbers = #tpu.dot_dimension_numbers<[2], [2], [1], [1], [0, 0, 0, 1, 1, 1], [0], [0]>} : vector<1x8x8xf32>, vector<1x8x8xf32>, vector<1x8x8xf32> -> vector<1x8x8xf32>
    %cst_24 = arith.constant -1.000000e+30 : f32
    "tpu.trace_stop"() : () -> ()
    %81 = vector.broadcast %cst_24 : f32 to vector<1x8x8xf32>
    %82 = arith.select %29, %80, %81 : vector<1x8x8xi1>, vector<1x8x8xf32>
    %cst_25 = arith.constant dense<0xFF800000> : vector<1x8xf32>
    %83 = vector.multi_reduction <maximumf>, %82, %cst_25 [2] : vector<1x8x8xf32> to vector<1x8xf32>
    %84 = vector.shape_cast %83 : vector<1x8xf32> to vector<1x8x1xf32>
    %85 = vector.broadcast %84 : vector<1x8x1xf32> to vector<1x8x8xf32>
    %86 = arith.subf %82, %85 : vector<1x8x8xf32>
    %87 = math.exp %86 : vector<1x8x8xf32>
    %cst_26 = arith.constant dense<0.000000e+00> : vector<1x8xf32>
    %88 = vector.multi_reduction <add>, %87, %cst_26 [2] : vector<1x8x8xf32> to vector<1x8xf32>
    %89 = vector.shape_cast %88 : vector<1x8xf32> to vector<1x8x1xf32>
    %90 = tpu.reciprocal %89 {approx = true} : vector<1x8x1xf32> -> vector<1x8x1xf32>
    %91 = vector.broadcast %90 : vector<1x8x1xf32> to vector<1x8x8xf32>
    %92 = arith.mulf %87, %91 : vector<1x8x8xf32>
    "tpu.trace_start"() <{level = 10 : i32, message = "bqk,bkd->bqd"}> : () -> ()
    %cst_27 = arith.constant dense<0.000000e+00> : vector<1x8x8xf32>
    %93 = tpu.matmul %92, %79, %cst_27 {dimension_numbers = #tpu.dot_dimension_numbers<[2], [1], [1], [2], [0, 0, 0, 1, 1, 2], [0], [0]>} : vector<1x8x8xf32>, vector<1x8x8xf32>, vector<1x8x8xf32> -> vector<1x8x8xf32>
    "tpu.trace_stop"() : () -> ()
    %94 = vector.shape_cast %93 : vector<1x8x8xf32> to vector<8x8xf32>
    %c0_28 = arith.constant 0 : index
    %c16 = arith.constant 16 : index
    %95 = vector.load %arg7[%c0_28, %c16] : memref<8x32xf32, #tpu.memory_space<vmem>>, vector<8x8xf32>
    tpu.vector_store %arg7[%c0_28, %c16], %94 {strides = array<i32>} : memref<8x32xf32, #tpu.memory_space<vmem>>, vector<8x8xf32>,
    %96 = vector.extract_strided_slice %25 {offsets = [0, 24], sizes = [8, 8], strides = [1, 1]} : vector<8x96xf32> to vector<8x8xf32>
    %97 = vector.shape_cast %96 : vector<8x8xf32> to vector<1x8x8xf32>
    %98 = vector.extract_strided_slice %25 {offsets = [0, 56], sizes = [8, 8], strides = [1, 1]} : vector<8x96xf32> to vector<8x8xf32>
    %99 = vector.shape_cast %98 : vector<8x8xf32> to vector<1x8x8xf32>
    %100 = vector.extract_strided_slice %25 {offsets = [0, 88], sizes = [8, 8], strides = [1, 1]} : vector<8x96xf32> to vector<8x8xf32>
    %101 = vector.shape_cast %100 : vector<8x8xf32> to vector<1x8x8xf32>
    "tpu.trace_start"() <{level = 10 : i32, message = "bqd,bkd->bqk"}> : () -> ()
    %cst_29 = arith.constant dense<0.000000e+00> : vector<1x8x8xf32>
    %102 = tpu.matmul %97, %99, %cst_29 {dimension_numbers = #tpu.dot_dimension_numbers<[2], [2], [1], [1], [0, 0, 0, 1, 1, 1], [0], [0]>} : vector<1x8x8xf32>, vector<1x8x8xf32>, vector<1x8x8xf32> -> vector<1x8x8xf32>
    %cst_30 = arith.constant -1.000000e+30 : f32
    "tpu.trace_stop"() : () -> ()
    %103 = vector.broadcast %cst_30 : f32 to vector<1x8x8xf32>
    %104 = arith.select %29, %102, %103 : vector<1x8x8xi1>, vector<1x8x8xf32>
    %cst_31 = arith.constant dense<0xFF800000> : vector<1x8xf32>
    %105 = vector.multi_reduction <maximumf>, %104, %cst_31 [2] : vector<1x8x8xf32> to vector<1x8xf32>
    %106 = vector.shape_cast %105 : vector<1x8xf32> to vector<1x8x1xf32>
    %107 = vector.broadcast %106 : vector<1x8x1xf32> to vector<1x8x8xf32>
    %108 = arith.subf %104, %107 : vector<1x8x8xf32>
    %109 = math.exp %108 : vector<1x8x8xf32>
    %cst_32 = arith.constant dense<0.000000e+00> : vector<1x8xf32>
    %110 = vector.multi_reduction <add>, %109, %cst_32 [2] : vector<1x8x8xf32> to vector<1x8xf32>
    %111 = vector.shape_cast %110 : vector<1x8xf32> to vector<1x8x1xf32>
    %112 = tpu.reciprocal %111 {approx = true} : vector<1x8x1xf32> -> vector<1x8x1xf32>
    %113 = vector.broadcast %112 : vector<1x8x1xf32> to vector<1x8x8xf32>
    %114 = arith.mulf %109, %113 : vector<1x8x8xf32>
    "tpu.trace_start"() <{level = 10 : i32, message = "bqk,bkd->bqd"}> : () -> ()
    %cst_33 = arith.constant dense<0.000000e+00> : vector<1x8x8xf32>
    %115 = tpu.matmul %114, %101, %cst_33 {dimension_numbers = #tpu.dot_dimension_numbers<[2], [1], [1], [2], [0, 0, 0, 1, 1, 2], [0], [0]>} : vector<1x8x8xf32>, vector<1x8x8xf32>, vector<1x8x8xf32> -> vector<1x8x8xf32>
    "tpu.trace_stop"() : () -> ()
    %116 = vector.shape_cast %115 : vector<1x8x8xf32> to vector<8x8xf32>
    %c0_34 = arith.constant 0 : index
    %c24 = arith.constant 24 : index
    %117 = vector.load %arg7[%c0_34, %c24] : memref<8x32xf32, #tpu.memory_space<vmem>>, vector<8x8xf32>
    tpu.vector_store %arg7[%c0_34, %c24], %116 {strides = array<i32>} : memref<8x32xf32, #tpu.memory_space<vmem>>, vector<8x8xf32>,
    %c0_35 = arith.constant 0 : index
    %c0_36 = arith.constant 0 : index
    %118 = vector.load %arg7[%c0_35, %c0_36] : memref<8x32xf32, #tpu.memory_space<vmem>>, vector<8x32xf32>
    %c0_37 = arith.constant 0 : index
    %c0_38 = arith.constant 0 : index
    %119 = vector.load %arg4[%c0_37, %c0_38] : memref<32x32xf32, #tpu.memory_space<vmem>>, vector<32x32xf32>
    %cst_39 = arith.constant dense<0.000000e+00> : vector<8x32xf32>
    %120 = tpu.matmul %118, %119, %cst_39 {dimension_numbers = #tpu.dot_dimension_numbers<[1], [0], [0], [1], [0, 0, 1, 1], [], []>} : vector<8x32xf32>, vector<32x32xf32>, vector<8x32xf32> -> vector<8x32xf32>
    %c0_40 = arith.constant 0 : index
    %c0_41 = arith.constant 0 : index
    %121 = vector.load %arg5[%c0_40, %c0_41] : memref<1x32xf32, #tpu.memory_space<vmem>>, vector<1x32xf32>
    %122 = vector.shape_cast %121 : vector<1x32xf32> to vector<32xf32>
    %123 = vector.shape_cast %122 : vector<32xf32> to vector<1x32xf32>
    %124 = vector.broadcast %123 : vector<1x32xf32> to vector<8x32xf32>
    %125 = arith.addf %120, %124 : vector<8x32xf32>
    %c0_42 = arith.constant 0 : index
    %c0_43 = arith.constant 0 : index
    %126 = vector.load %arg6[%c0_42, %c0_43] : memref<8x32xf32, #tpu.memory_space<vmem>>, vector<8x32xf32>
    tpu.vector_store %arg6[%c0_42, %c0_43], %125 {strides = array<i32>} : memref<8x32xf32, #tpu.memory_space<vmem>>, vector<8x32xf32>,
    return
  }
  func.func @transform_0(%arg0: i32) -> (i32, i32) {
    %c0_i32 = arith.constant 0 : i32
    %c0_i32_0 = arith.constant 0 : i32
    return %arg0, %c0_i32 : i32, i32
  }
  func.func @transform_1(%arg0: i32) -> (i32, i32) {
    %c0_i32 = arith.constant 0 : i32
    %c0_i32_0 = arith.constant 0 : i32
    %c0_i32_1 = arith.constant 0 : i32
    return %c0_i32, %c0_i32_0 : i32, i32
  }
  func.func @transform_2(%arg0: i32) -> (i32, i32) {
    %c0_i32 = arith.constant 0 : i32
    %c0_i32_0 = arith.constant 0 : i32
    %c0_i32_1 = arith.constant 0 : i32
    return %c0_i32, %c0_i32_0 : i32, i32
  }
  func.func @transform_3(%arg0: i32) -> (i32, i32) {
    %c0_i32 = arith.constant 0 : i32
    %c0_i32_0 = arith.constant 0 : i32
    %c0_i32_1 = arith.constant 0 : i32
    return %c0_i32, %c0_i32_0 : i32, i32
  }
  func.func @transform_4(%arg0: i32) -> (i32, i32) {
    %c0_i32 = arith.constant 0 : i32
    %c0_i32_0 = arith.constant 0 : i32
    %c0_i32_1 = arith.constant 0 : i32
    return %c0_i32, %c0_i32_0 : i32, i32
  }
  func.func @transform_5(%arg0: i32) -> (i32, i32) {
    %c0_i32 = arith.constant 0 : i32
    %c0_i32_0 = arith.constant 0 : i32
    return %arg0, %c0_i32 : i32, i32
  }
}

</mosaic_0001>

<bundles_post_ra>
// kernel: tpu_custom_call.1
= control target key start
LH: loop header
LB: loop body
LE: loop exit
PB: predicated region body
PF: predicated region fallthrough
CT: control target
= control target key end

     0   :  { %10 = vsyncpa [#allocation4], 0  ;;  %s2008_s0 = inlined_call_operand.hbm [shape: f32[16,32], index: 0, kind: input, shape index: {}]   ;;  %s2009_s1 = inlined_call_operand.hbm [shape: f32[32,96], index: 1, kind: input, shape index: {}]   ;;  %s2010_s2 = inlined_call_operand.vmem [shape: f32[1,96], index: 2, kind: input, shape index: {}]   ;;  %s2011_s3 = inlined_call_operand.hbm [shape: f32[32,32], index: 3, kind: input, shape index: {}]   ;;  %s2012_s4 = inlined_call_operand.vmem [shape: f32[1,32], index: 4, kind: input, shape index: {}]   ;;  %s2013_s5 = inlined_call_operand.hbm [shape: f32[16,32], index: 5, kind: output, shape index: {}]  }
   0x1   :  { %12 = vsyncpa [#allocation4 + $0x1], 0 }
   0x2   :  { %13 = vsyncpa [#allocation7], 0 }
   0x3   :  { %14 = vsyncpa [#allocation5], 0 }
   0x4   :  { %16 = vsyncpa [#allocation5 + $0x1], 0  ;;  %s1693_s18 = smov 0   ;;  %s1695_s19 = smov 0  }
   0x5   :  { %s1697_s20 = smov 0   ;;  %s1699_s21 = smov 0  }
   0x6 LB: > { %s1714_s22 = sadd.s32 4294967295, %s1638_s21   ;;  %s1246_s23 = sadd.s32 4294967294, %s1638_s21   ;;  %s1638_s21 = sphi %s1699_s21, %s2033_s21   ;;  %s1634_s20 = sphi %s1697_s20, %s2032_s20   ;;  %s1630_s19 = sphi %s1695_s19, %s2031_s19   ;;  %s1626_s18 = sphi %s1693_s18, %s2030_s18  }
   0x7   : > { %p42_p0 = scmp.ne.s32.totalorder %s1630_s19, %s1626_s18  ;;  %p2014_p1 = scmp.eq.s32.totalorder %s1714_s22, 0 }
   0x8   : > { %p156_p3 = scmp.eq.s32.totalorder %s1246_s23, 1  ;;  %p1247_p5 = scmp.ge.s32.totalorder %s1638_s21, 1 }
   0x9   : > { %p1723_p4 = por %p2014_p1, %p42_p0  ;;  %p163_p7 = scmp.lt.s32.totalorder %s1638_s21, 3 }
   0xa   : > { %p1728_p6 = por %p156_p3, %p42_p0  ;;  %s1640_s27 = smov [#allocation6]  }
   0xb   : > { %s2017_s24 = scalar_select %p1723_p4, 1, 0 }
   0xc   : > { %s2018_s25 = scalar_select %p1728_p6, 1, 0 }
   0xd   : > { %p1733_p8 = pnand %p1247_p5, %p163_p7  ;;  %s175_s28 = sshll.u32 %s1640_s27, 4  ;;  %s1737_s28 = int_to_ptr.vmem [resolvable:$true] %s175_s28 }
   0xe   : > { %s1641_s30 = smov [#allocation8]   ;;  %s1482_s9 = scalar_lea.hbm %s2009_s1, 512 }
   0xf   : > { %p1390_p9 = pneg %p1733_p8  ;;  %s191_s6 = sshll.u32 %s1641_s30, 4  ;;  %s1748_s6 = int_to_ptr.vmem [resolvable:$true] %s191_s6 }
  0x10   : > { %p1483_p12 = scmp.ne.s32.totalorder %s2009_s1, %s1482_s9  ;;  %p1489_p5 = scmp.lt.u32.totalorder %s1482_s9, %s2009_s1 }
  0x11   : > { %p1744_p11 = pnand %p1390_p9, %p2014_p1 }
  0x13   : > { %p1484_p13 = pneg %p1744_p11 }
  0x15   : > { %p1485_p0 = pnand %p1484_p13, %p1483_p12 }
  0x17   : > { %p1486_p3 = pneg %p1485_p0 }
  0x19   : > { %p1491_p7 = pnand %p1489_p5, %p1486_p3 }
  0x1b   : > { %1494 = shalt.err (!%p1491_p7)
}
  0x1c   : > { %s1495_s14 = scalar_lea.vmem %s1737_s28, 512  ;;  %p1503_p2 = scmp.lt.s32.totalorder %s1737_s28, %s1737_s28 }
  0x1d   : > { %p1496_p9 = scmp.ne.s32.totalorder %s1737_s28, %s1495_s14  ;;  %p1504_p12 = scmp.lt.s32.totalorder %s1495_s14, %s1495_s14 }
  0x1f   : > { %p1498_p10 = pnand %p1496_p9, %p1484_p13  ;;  %p1505_p0 = por %p1504_p12, %p1503_p2 }
  0x21   : > { %p1499_p1 = pneg %p1498_p10 }
  0x23   : > { %p1506_p6 = pnand %p1505_p0, %p1499_p1 }
  0x25   : > { %1509 = shalt.err (!%p1506_p6)
}
  0x26   : > { %s1642_s15 = smov 128   ;;  %s1643_s16 = smov 8  }
  0x27   : > { %1393 = dma.hbm_to_vmem [thread:$0]  (!%p1744_p11), %s2009_s1, 512, %s1737_s28, [#allocation7], %s1642_s15, %s1642_s15, %s1643_s16  }
  0x28   : > { %s1510_s7 = scalar_lea.hbm %s2011_s3, 512 }
  0x29   : > { %p1511_p2 = scmp.ne.s32.totalorder %s2011_s3, %s1510_s7  ;;  %p1517_p10 = scmp.lt.u32.totalorder %s1510_s7, %s2011_s3 }
  0x2b   : > { %p1513_p1 = pnand %p1511_p2, %p1484_p13 }
  0x2d   : > { %p1514_p6 = pneg %p1513_p1 }
  0x2f   : > { %p1519_p3 = pnand %p1517_p10, %p1514_p6 }
  0x31   : > { %1522 = shalt.err (!%p1519_p3)
}
  0x32   : > { %s1523_s28 = scalar_lea.vmem %s1748_s6, 512  ;;  %p1531_p12 = scmp.lt.s32.totalorder %s1748_s6, %s1748_s6 }
  0x33   : > { %p1524_p5 = scmp.ne.s32.totalorder %s1748_s6, %s1523_s28  ;;  %p1532_p0 = scmp.lt.s32.totalorder %s1523_s28, %s1523_s28 }
  0x35   : > { %p1526_p7 = pnand %p1524_p5, %p1484_p13  ;;  %p1533_p2 = por %p1532_p0, %p1531_p12 }
  0x37   : > { %p1527_p9 = pneg %p1526_p7 }
  0x39   : > { %p1534_p1 = pnand %p1533_p2, %p1527_p9 }
  0x3b   : > { %1537 = shalt.err (!%p1534_p1)
}
  0x3c   : > { %1396 = dma.hbm_to_vmem [thread:$0]  (!%p1744_p11), %s2011_s3, 512, %s1748_s6, [#allocation7], %s1642_s15, %s1642_s15, %s1643_s16  }
  0x3d   : > { %s1803_s14 = sadd.s32 1, %s1638_s21   ;;  %s29_s29 = sadd.s32 1, %s1634_s20 }
  0x3e   : > { %s26_s17 = ssub.s32 %s1638_s21, %s1803_s14  ;;  %p36_p13 = scmp.ne.s32.totalorder %s1634_s20, %s1630_s19 }
  0x3f   : > { %p27_p6 = scmp.eq.s32.totalorder %s26_s17, 0  ;;  %p37_p10 = scmp.eq.s32.totalorder %s1638_s21, 0 }
  0x40   : > { %p2021_p3 = scmp.eq.s32.totalorder %s1714_s22, 1  ;;  %p1407_p7 = scmp.lt.s32.totalorder %s1638_s21, 2 }
  0x41   : > { %s1819_s27 = scalar_select %p27_p6, %s1634_s20, %s29_s29  }
  0x42   : > { %p1813_p5 = por %p2021_p3, %p36_p13  ;;  %p38_p9 = por %p37_p10, %p36_p13 }
  0x43   : > { %s208_s30 = sand.u32 1, %s1634_s20   ;;  %s1252_s6 = sshll.u32 %s1638_s21, 7 }
  0x44   : > { %s2022_s23 = scalar_select %p1813_p5, 1, 0 }
  0x45   : > { %s1251_s7 = sshll.u32 %s208_s30, 3  ;;  %s1826_s8 = scalar_lea.hbm %s2008_s0, %s1252_s6 }
  0x46   : > { %s212_s9 = scalar_lea.vmem [#allocation3], %s1251_s7  ;;  %p1830_p11 = pnand %p1407_p7, %p38_p9 }
  0x47   : > { %s219_s10 = sshll.u32 %s212_s9, 4  ;;  %s209_s28 = scalar_lea.sflag [#allocation4], %s208_s30  ;;  %s1828_s10 = int_to_ptr.vmem [resolvable:$true] %s219_s10 }
  0x48   : > { %s1538_s12 = scalar_lea.hbm %s1826_s8, 128  ;;  %p1540_p0 = pneg %p1830_p11 }
  0x49   : > { %p1539_p12 = scmp.ne.s32.totalorder %s1826_s8, %s1538_s12  ;;  %s1543_s17 = scalar_lea.hbm %s2008_s0, 256 }
  0x4a   : > { %p1544_p13 = scmp.lt.u32.totalorder %s1826_s8, %s2008_s0  ;;  %p1545_p6 = scmp.lt.u32.totalorder %s1543_s17, %s1538_s12 }
  0x4b   : > { %p1541_p2 = pnand %p1540_p0, %p1539_p12  ;;  %p1547_p3 = scmp.lt.u32.totalorder %s1538_s12, %s1826_s8 }
  0x4c   : > { %p1546_p10 = por %p1545_p6, %p1544_p13 }
  0x4d   : > { %p1542_p1 = pneg %p1541_p2 }
  0x4e   : > { %p1548_p7 = por %p1547_p3, %p1546_p10 }
  0x50   : > { %p1549_p9 = pnand %p1548_p7, %p1542_p1 }
  0x52   : > { %1552 = shalt.err (!%p1549_p9)
}
  0x53   : > { %s1553_s30 = scalar_lea.vmem %s1828_s10, 128  ;;  %s1644_s15 = smov [#allocation3]  }
  0x54   : > { %p1554_p12 = scmp.ne.s32.totalorder %s1828_s10, %s1553_s30  ;;  %s1558_s16 = sshll.u32 %s1644_s15, 4  ;;  %s1559_s16 = int_to_ptr.vmem [resolvable:$false] %s1558_s16 }
  0x55   : > { %s1560_s9 = scalar_lea.vmem %s1559_s16, 256  ;;  %p1561_p4 = scmp.lt.s32.totalorder %s1828_s10, %s1559_s16 }
  0x56   : > { %p1556_p2 = pnand %p1554_p12, %p1540_p0  ;;  %p1562_p13 = scmp.lt.s32.totalorder %s1560_s9, %s1553_s30 }
  0x58   : > { %p1557_p5 = pneg %p1556_p2  ;;  %p1563_p6 = por %p1562_p13, %p1561_p4 }
  0x5a   : > { %p1564_p10 = pnand %p1563_p6, %p1557_p5 }
  0x5c   : > { %1567 = shalt.err (!%p1564_p10)
}
  0x5d   : > { %1400 = dma.hbm_to_vmem [thread:$0]  (!%p1830_p11), %s1826_s8, 128, %s1828_s10, %s209_s28  }
  0x5e   : > { %228 = sbr.rel (%p1733_p8) target bundleno = 2376 (0x948), region = 40  ;;  %s1862_s12 = sand.u32 (!%p1733_p8), 1, %s1630_s19  }
  0x5f   : > { %s1254_s13 = sshll.u32 (!%p1733_p8), %s1862_s12, 3  ;;  %s231_s29 = scalar_lea.sflag (!%p1733_p8), [#allocation4], %s1862_s12 }
  0x60   : > { %s234_s17 = scalar_lea.vmem (!%p1733_p8), [#allocation3], %s1254_s13  ;;  %p2024_p4 = scmp.ne.s32.totalorder (!%p1733_p8), %s2017_s24, 0 }
  0x65   : > { %1613 = dma.done.wait (%p2024_p4), %s231_s29, 128  }
  0x66   : > { %1615 = vsyncadd (%p2024_p4), %s231_s29, 4294967168  ;;  %p2025_p5 = scmp.eq.s32.totalorder %s1714_s22, 0 }
  0x68   : > { %1617 = dma.done.wait (%p2025_p5), [#allocation7], 1024   ;;  %p2026_p8 = pmov %p2025_p5 }
  0x69   : > { %vm270_vm0 = vcmask 261120   ;;  %v269_v0 = vld [vmem:[%s234_s17] sm:$0xff]  ;;  %v285_v7 = vld [vmem:[#allocation6] sm:$0xff]  ;;  %v286_v8 = vld [vmem:[#allocation6 + $0x8] sm:$0xff]  ;;  %v1645_v10 = vmov 0.0|0.0   ;;  %vm1646_vm1 = vmmov 0   ;;  %v369_v26 = vlaneseq }
  0x6a   : > { %1619 = vsyncadd (%p2026_p8), [#allocation7], 4294966272  ;;  %v271_v1 = vsel %vm270_vm0, %v269_v0, 0.0  ;;  %v287_v9 = vld [vmem:[#allocation6 + $0x10] sm:$0xff]  ;;  %1366 = vmatprep.subr.bf16.mxu0 %v1645_v10  ;;  %v1367_v11 = vpack.c.bf16 %v286_v8, %v285_v7  ;;  %v288_v12 = vld [vmem:[#allocation6 + $0x18] sm:$0xff]  ;;  %v1647_v13 = vmov 0.0  }
  0x6b   : > { %272 = vadd.xlane.f32.xlu0 %v271_v1  ;;  %1312 = vmatprep.mubr.msk.f32.mxu0 %vm1646_vm1, %v1647_v13  ;;  %v1370_v14 = vpack.c.bf16 %v288_v12, %v287_v9  ;;  %v1258_v20 = vld [vmem:[%s2010_s2] ss:$0 sm:$0xff]  ;;  %s1648_s8 = smov 64   ;;  %s1649_s10 = smov 96   ;;  %vm377_vm2 = vcmask 64512   ;;  %v370_v27 = vshrl.u32 %v369_v26, 7 }
  0x6c   : > { %1315 = vmatprep.subr.mxu1 %v1647_v13  ;;  %1317 = vmatprep.mubr.msk.f32.mxu1 %vm1646_vm1, %v1647_v13  ;;  %s1650_s11 = smov 88   ;;  %s1651_s28 = smov 120   ;;  %v372_v28 = vand.u32 127, %v369_v26  ;;  %v1058_v26 = vld [vmem:[#allocation8] sm:$0xff]  ;;  %vm711_vm4 = vcmask 130112   ;;  %vm883_vm5 = vcmask 195712  }
  0x6d   : > { %1368 = vmatpush3.bf16.msra.mxu0 %v1367_v11  ;;  %s1652_s7 = smov 80   ;;  %s1653_s6 = smov 112   ;;  %vm1055_vm6 = vcmask 261312  }
  0x6e   : > { %1369 = vmatprep.subr.bf16.mxu0 %v1645_v10  ;;  %vm373_vm3 = vcmp.le.s32.totalorder %v372_v28, %v370_v27  ;;  %s1654_s30 = smov 72   ;;  %s1655_s15 = smov 104   ;;  %v1059_v27 = vld [vmem:[#allocation8 + $0x8] sm:$0xff] }
  0x6f   : > { %s1656_s16 = smov 48   ;;  %s1657_s9 = smov 56   ;;  %v1373_v28 = vpack.c.bf16 %v1059_v27, %v1058_v26 }
  0x70   : > { %s1658_s29 = smov 40   ;;  %s1659_s17 = smov 8  }
  0x71   : > { %1371 = vmatpush3.bf16.msra.mxu0 %v1370_v14  ;;  %s1660_s24 = smov 16   ;;  %s1661_s26 = smov 24  }
  0x72   : > { %1335 = vmatprep.subr.mxu0 %v1647_v13  ;;  %p2027_p0 = scmp.ne.s32.totalorder %s2022_s23, 0 }
  0xf8   : > { %v273_v2 = vpop.xlane.xlu0 %272 }
  0xf9   : > { %v275_v3 = vmul.f32 0.03125, %v273_v2 }
  0xfb   : > { %v276_v4 = vsub.f32 %v269_v0, %v275_v3 }
  0xfd   : > { %v277_v5 = vmul.f32 %v276_v4, %v276_v4 }
  0xff   : > { %v278_v6 = vsel %vm270_vm0, %v277_v5, 0.0 }
 0x100   : > { %279 = vadd.xlane.f32.xlu0 %v278_v6 }
 0x18d   : > { %v280_v15 = vpop.xlane.xlu0 %279 }
 0x18e   : > { %v281_v16 = vmul.f32 0.03125, %v280_v15 }
 0x190   : > { %v282_v17 = vadd.f32 1e-05, %v281_v16 }
 0x192   : > { %1464 = vrsqrt.f32 %v282_v17 }
 0x19c   : > { %v1465_v18 = vpop.eup %1464 }
 0x19d   : > { %v284_v19 = vmul.f32 %v1465_v18, %v276_v4 }
 0x19f   : > { %1313 = vmatmul.mubr.msk.f32.vlgmr.msra.gmra.mrb[0].mxu0 %vm270_vm0, %v284_v19 }
 0x1a0   : > { %1337 = vmatprep.mubr.msk.f32.mxu0 %vm1646_vm1, %v1647_v13 }
 0x272   : > { %v365_v21 = vpop.f32.mrb[0].mxu0 }
 0x273   : > { %v1892_v22 = vadd.f32 %v1258_v20, %v365_v21  ;;  %v1314_v23 = vpop.f32.mrb[1].mxu0 }
 0x275   : > { %464 = vrot.lane.b32.xlu0 %v1892_v22, %s1648_s8  ;;  %375 = vrot.lane.b32.xlu1 %v1892_v22, %s1649_s10 }
 0x279   : > { %543 = vrot.lane.b32.xlu0 %v1892_v22, %s1650_s11  ;;  %s1275_s11 = sshll.u32 %s1714_s22, 7 }
 0x27d   : > { %541 = vrot.lane.b32.xlu0 %v1892_v22, %s1651_s28  ;;  %s268_s28 = scalar_lea.vmem [#allocation9], %s1254_s13  ;;  %s1662_s13 = smov [#allocation9]  }
 0x2e7   : > { %v376_v24 = vpop.permute.xlu1 %375  ;;  %v465_v25 = vpop.permute.xlu0 %464 }
 0x2e8   : > { %1316 = vmatpush3.xpose.msk.msra.mxu1 %vm377_vm2, %v376_v24 }
 0x2e9   : > { %1320 = vmatprep.subr.mxu1 %v1647_v13 }
 0x2eb   : > { %1318 = vmatmul.mubr.msk.f32.vlgmr.msra.gmra.mrb[0].mxu1 %vm377_vm2, %v1892_v22  ;;  %v544_v39 = vpop.permute.xlu0 %543 }
 0x2ec   : > { %1321 = vmatpush3.msra.mxu1 %v465_v25  ;;  %1322 = vmatprep.mubr.msk.f32.mxu1 %vm1646_vm1, %v1647_v13 }
 0x2ed   : > { %1325 = vmatprep.subr.mxu1 %v1647_v13 }
 0x2ef   : > { %v542_v40 = vpop.permute.xlu0 %541 }
 0x3be   : > { %v448_v29 = vpop.f32.mrb[0].mxu1 }
 0x3bf   : > { %v452_v30 = vsel %vm373_vm3, %v448_v29, -1e+30  ;;  %v1319_v31 = vpop.f32.mrb[1].mxu1  ;;  %v1060_v29 = vld [vmem:[#allocation8 + $0x10] sm:$0xff] }
 0x3c0   : > { %v453_v32 = vsel %vm377_vm2, %v452_v30, -inf }
 0x3c1   : > { %454 = vmax.xlane.f32.xlu1 %v453_v32 }
 0x3d2   : > { %715 = vrot.lane.b32.xlu1 %v1892_v22, %s1652_s7  ;;  %s1157_s7 = sshll.u32 %s268_s28, 4  ;;  %s1965_s7 = int_to_ptr.vmem [resolvable:$true] %s1157_s7 }
 0x3d3   : > { %s1568_s22 = scalar_lea.vmem %s1965_s7, 128 }
 0x3d4   : > { %p1569_p11 = scmp.ne.s32.totalorder %s1965_s7, %s1568_s22 }
 0x3d6   : > { %p1570_p1 = pnand %p1569_p11, %p2027_p0 }
 0x3d8   : > { %p1571_p3 = pneg %p1570_p1 }
 0x44e   : > { %v455_v33 = vpop.xlane.xlu1 %454 }
 0x44f   : > { %v456_v34 = vsub.f32 %v452_v30, %v455_v33  ;;  %v1061_v30 = vld [vmem:[#allocation8 + $0x18] sm:$0xff] }
 0x450   : > { %v1376_v31 = vpack.c.bf16 %v1061_v30, %v1060_v29 }
 0x451   : > { %v457_v35 = vmul.f32 1.442695, %v456_v34 }
 0x452   : > { %v716_v36 = vpop.permute.xlu1 %715 }
 0x453   : > { %1466 = vpow2.f32 %v457_v35  ;;  %1336 = vmatpush3.xpose.msk.msra.mxu0 %vm377_vm2, %v716_v36 }
 0x454   : > { %1345 = vmatprep.subr.mxu0 %v1647_v13 }
 0x45d   : > { %v1467_v37 = vpop.eup %1466 }
 0x45e   : > { %v459_v38 = vsel %vm377_vm2, %v1467_v37, 0.0 }
 0x45f   : > { %460 = vadd.xlane.f32.xlu0 %v459_v38 }
 0x475   : > { %713 = vrot.lane.b32.xlu0 %v1892_v22, %s1653_s6 }
 0x479   : > { %887 = vrot.lane.b32.xlu0 %v1892_v22, %s1654_s30 }
 0x47d   : > { %885 = vrot.lane.b32.xlu0 %v1892_v22, %s1655_s15  ;;  %s1963_s15 = scalar_lea.hbm %s2013_s5, %s1275_s11 }
 0x4ec   : > { %v461_v41 = vpop.xlane.xlu0 %460 }
 0x4ed   : > { %1468 = vrcp.f32 %v461_v41 }
 0x4f0   : > { %v714_v42 = vpop.permute.xlu0 %713 }
 0x4f1   : > { %1338 = vmatmul.mubr.msk.f32.vlgmr.msra.gmra.mrb[2].mxu0 %vm377_vm2, %v714_v42 }
 0x4f2   : > { %1347 = vmatprep.mubr.msk.f32.mxu0 %vm1646_vm1, %v1647_v13 }
 0x4f4   : > { %v888_v43 = vpop.permute.xlu0 %887 }
 0x4f5   : > { %1346 = vmatpush3.xpose.msk.msra.mxu0 %vm377_vm2, %v888_v43 }
 0x4f6   : > { %1372 = vmatprep.subr.bf16.mxu0 %v1645_v10 }
 0x4f7   : > { %v1469_v44 = vpop.eup %1468 }
 0x4f8   : > { %v463_v45 = vmul.f32 %v1469_v44, %v1467_v37  ;;  %v886_v46 = vpop.permute.xlu0 %885 }
 0x4f9   : > { %1348 = vmatmul.mubr.msk.f32.vlgmr.msra.gmra.mrb[4].mxu0 %vm377_vm2, %v886_v46 }
 0x4fa   : > { %1323 = vmatmul.mubr.msk.f32.vlgmr.msra.gmra.mrb[2].mxu1 %vm377_vm2, %v463_v45  ;;  %1363 = vmatprep.mubr.msk.f32.mxu0 %vm1646_vm1, %v1647_v13 }
 0x4fb   : > { %1326 = vmatpush3.xpose.msk.msra.mxu1 %vm377_vm2, %v544_v39  ;;  %1327 = vmatprep.mubr.msk.f32.mxu1 %vm1646_vm1, %v1647_v13 }
 0x4fc   : > { %1330 = vmatprep.subr.mxu1 %v1647_v13  ;;  %1374 = vmatpush3.bf16.msra.mxu0 %v1373_v28 }
 0x4fd   : > { %1375 = vmatprep.subr.bf16.mxu0 %v1645_v10 }
 0x4fe   : > { %1328 = vmatmul.mubr.msk.f32.vlgmr.msra.gmra.mrb[4].mxu1 %vm377_vm2, %v542_v40  ;;  %v1272_v40 = vld [vmem:[%s2012_s4] ss:$0 sm:$0xff] }
 0x4ff   : > { %1332 = vmatprep.mubr.msk.f32.mxu1 %vm1646_vm1, %v1647_v13 }
 0x500   : > { %1377 = vmatpush3.bf16.msra.mxu0 %v1376_v31 }
 0x5c4   : > { %v787_v47 = vpop.f32.mrb[2].mxu0 }
 0x5c5   : > { %v791_v48 = vsel %vm373_vm3, %v787_v47, -1e+30  ;;  %v1339_v49 = vpop.f32.mrb[3].mxu0 }
 0x5c6   : > { %v792_v50 = vsel %vm377_vm2, %v791_v48, -inf }
 0x5c7   : > { %793 = vmax.xlane.f32.xlu1 %v792_v50 }
 0x5cc   : > { %v959_v51 = vpop.f32.mrb[4].mxu0 }
 0x5cd   : > { %v536_v52 = vpop.f32.mrb[2].mxu1  ;;  %v1349_v53 = vpop.f32.mrb[5].mxu0  ;;  %v963_v59 = vsel %vm373_vm3, %v959_v51, -1e+30 }
 0x5ce   : > { %540 = vst.msk [vmem:[#allocation2] sm:$0xff] %vm377_vm2, %v536_v52  ;;  %v1324_v54 = vpop.f32.mrb[3].mxu1  ;;  %v964_v60 = vsel %vm377_vm2, %v963_v59, -inf }
 0x5d1   : > { %v615_v55 = vpop.f32.mrb[4].mxu1 }
 0x5d2   : > { %v619_v56 = vsel %vm373_vm3, %v615_v55, -1e+30  ;;  %v1329_v57 = vpop.f32.mrb[5].mxu1 }
 0x5d3   : > { %v620_v58 = vsel %vm377_vm2, %v619_v56, -inf }
 0x5d4   : > { %621 = vmax.xlane.f32.xlu0 %v620_v58 }
 0x5d8   : > { %965 = vmax.xlane.f32.xlu0 %v964_v60 }
 0x654   : > { %v794_v61 = vpop.xlane.xlu1 %793 }
 0x655   : > { %v795_v62 = vsub.f32 %v791_v48, %v794_v61 }
 0x657   : > { %v796_v63 = vmul.f32 1.442695, %v795_v62 }
 0x659   : > { %1470 = vpow2.f32 %v796_v63 }
 0x661   : > { %v622_v0 = vpop.xlane.xlu0 %621 }
 0x662   : > { %v623_v1 = vsub.f32 %v619_v56, %v622_v0 }
 0x663   : > { %v1471_v2 = vpop.eup %1470 }
 0x664   : > { %v624_v3 = vmul.f32 1.442695, %v623_v1  ;;  %v798_v4 = vsel %vm377_vm2, %v1471_v2, 0.0 }
 0x665   : > { %799 = vadd.xlane.f32.xlu0 %v798_v4  ;;  %v966_v5 = vpop.xlane.xlu0 %965 }
 0x666   : > { %1472 = vpow2.f32 %v624_v3  ;;  %v967_v6 = vsub.f32 %v963_v59, %v966_v5 }
 0x668   : > { %v968_v7 = vmul.f32 1.442695, %v967_v6 }
 0x66a   : > { %1474 = vpow2.f32 %v968_v7 }
 0x670   : > { %v1473_v8 = vpop.eup %1472 }
 0x671   : > { %v626_v9 = vsel %vm377_vm2, %v1473_v8, 0.0 }
 0x672   : > { %627 = vadd.xlane.f32.xlu0 %v626_v9 }
 0x674   : > { %v1475_v11 = vpop.eup %1474 }
 0x675   : > { %v970_v12 = vsel %vm377_vm2, %v1475_v11, 0.0 }
 0x676   : > { %971 = vadd.xlane.f32.xlu1 %v970_v12 }
 0x687   : > { %803 = vrot.lane.b32.xlu1 %v1892_v22, %s1656_s16  ;;  %s1144_s16 = scalar_lea.sflag [#allocation5], %s1862_s12 }
 0x688   : > { %631 = vrot.lane.b32.xlu0 %v1892_v22, %s1657_s9  ;;  %s1572_s9 = sshll.u32 %s1662_s13, 4  ;;  %s1573_s9 = int_to_ptr.vmem [resolvable:$false] %s1572_s9 }
 0x689   : > { %p1575_p7 = scmp.lt.s32.totalorder %s1965_s7, %s1573_s9 }
 0x68b   : > { %975 = vrot.lane.b32.xlu1 %v1892_v22, %s1658_s29  ;;  %s1574_s29 = scalar_lea.vmem %s1573_s9, 256 }
 0x68c   : > { %p1576_p9 = scmp.lt.s32.totalorder %s1574_s29, %s1568_s22 }
 0x68e   : > { %p1577_p12 = por %p1576_p9, %p1575_p7 }
 0x690   : > { %p1578_p2 = pnand %p1577_p12, %p1571_p3 }
 0x6f2   : > { %v800_v14 = vpop.xlane.xlu0 %799 }
 0x6ff   : > { %v628_v15 = vpop.xlane.xlu0 %627 }
 0x700   : > { %1476 = vrcp.f32 %v628_v15 }
 0x701   : > { %1478 = vrcp.f32 %v800_v14 }
 0x703   : > { %v972_v16 = vpop.xlane.xlu1 %971  ;;  %v632_v17 = vpop.permute.xlu0 %631 }
 0x704   : > { %1331 = vmatpush3.msra.mxu1 %v632_v17  ;;  %1480 = vrcp.f32 %v972_v16 }
 0x705   : > { %1340 = vmatprep.subr.mxu1 %v1647_v13 }
 0x707   : > { %v804_v20 = vpop.permute.xlu1 %803 }
 0x70a   : > { %v1477_v18 = vpop.eup %1476 }
 0x70b   : > { %v630_v19 = vmul.f32 %v1477_v18, %v1473_v8  ;;  %v1479_v21 = vpop.eup %1478  ;;  %v976_v24 = vpop.permute.xlu1 %975 }
 0x70c   : > { %v802_v22 = vmul.f32 %v1479_v21, %v1471_v2 }
 0x70d   : > { %1333 = vmatmul.mubr.msk.f32.vlgmr.msra.gmra.mrb[6].mxu1 %vm377_vm2, %v630_v19 }
 0x70e   : > { %1341 = vmatpush3.msra.mxu1 %v804_v20  ;;  %1342 = vmatprep.mubr.msk.f32.mxu1 %vm1646_vm1, %v1647_v13  ;;  %v1481_v23 = vpop.eup %1480 }
 0x70f   : > { %1350 = vmatprep.subr.mxu1 %v1647_v13  ;;  %v974_v25 = vmul.f32 %v1481_v23, %v1475_v11 }
 0x711   : > { %1343 = vmatmul.mubr.msk.f32.vlgmr.msra.gmra.mrb[8].mxu1 %vm377_vm2, %v802_v22 }
 0x712   : > { %1351 = vmatpush3.msra.mxu1 %v976_v24  ;;  %1352 = vmatprep.mubr.msk.f32.mxu1 %vm1646_vm1, %v1647_v13 }
 0x715   : > { %1353 = vmatmul.mubr.msk.f32.vlgmr.msra.gmra.mrb[10].mxu1 %vm377_vm2, %v974_v25 }
 0x7e0   : > { %v703_v32 = vpop.f32.mrb[6].mxu1 }
 0x7e1   : > { %708 = vrot.lane.b32.xlu1 %v703_v32, %s1659_s17  ;;  %v1334_v33 = vpop.f32.mrb[7].mxu1 }
 0x7e4   : > { %v875_v34 = vpop.f32.mrb[8].mxu1 }
 0x7e5   : > { %880 = vrot.lane.b32.xlu0 %v875_v34, %s1660_s24  ;;  %v1344_v13 = vpop.f32.mrb[9].mxu1 }
 0x7e8   : > { %v1047_v35 = vpop.f32.mrb[10].mxu1 }
 0x7e9   : > { %1052 = vrot.lane.b32.xlu1 %v1047_v35, %s1661_s26  ;;  %v1354_v36 = vpop.f32.mrb[11].mxu1 }
 0x853   : > { %v709_v37 = vpop.permute.xlu1 %708 }
 0x854   : > { %712 = vst.msk [vmem:[#allocation2] sm:$0xff] %vm711_vm4, %v709_v37 }
 0x857   : > { %v881_v10 = vpop.permute.xlu0 %880 }
 0x858   : > { %884 = vst.msk [vmem:[#allocation2] sm:$0xff] %vm883_vm5, %v881_v10 }
 0x85b   : > { %v1053_v38 = vpop.permute.xlu1 %1052 }
 0x85c   : > { %1056 = vst.msk [vmem:[#allocation2] sm:$0xff] %vm1055_vm6, %v1053_v38 }
 0x863   : > { %v1057_v39 = vld [vmem:[#allocation2] sm:$0xff] }
 0x864   : > { %1364 = vmatmul.mubr.msk.f32.vlgmr.msra.gmra.mrb[6].mxu0 %vm270_vm0, %v1057_v39 }
 0x937   : > { %v1138_v41 = vpop.f32.mrb[6].mxu0 }
 0x938   : > { %v1139_v42 = vadd.f32 %v1272_v40, %v1138_v41  ;;  %v1365_v43 = vpop.f32.mrb[7].mxu0 }
 0x93a   : > { %1142 = vst.msk [vmem:[%s268_s28] sm:$0xff] %vm270_vm0, %v1139_v42 }
 0x93b   : > { %1581 = shalt.err (!%p1578_p2)
}
 0x93c   : > { %s1582_s12 = scalar_lea.hbm %s1963_s15, 128  ;;  %s1586_s26 = scalar_lea.hbm %s2013_s5, 256 }
 0x93d   : > { %p1583_p13 = scmp.ne.s32.totalorder %s1963_s15, %s1582_s12  ;;  %p1587_p4 = scmp.lt.u32.totalorder %s1963_s15, %s2013_s5 }
 0x93e   : > { %p1588_p5 = scmp.lt.u32.totalorder %s1586_s26, %s1582_s12  ;;  %p1590_p11 = scmp.lt.u32.totalorder %s1582_s12, %s1963_s15 }
 0x93f   : > { %p1584_p6 = pnand %p1583_p13, %p2027_p0 }
 0x940   : > { %p1589_p8 = por %p1588_p5, %p1587_p4 }
 0x941   : > { %p1585_p10 = pneg %p1584_p6 }
 0x942   : > { %p1591_p1 = por %p1590_p11, %p1589_p8 }
 0x944   : > { %p1592_p3 = pnand %p1591_p1, %p1585_p10 }
 0x946   : > { %1595 = shalt.err (!%p1592_p3)
}
 0x947   : > { %1388 = dma.vmem_to_hbm [thread:$0]  (%p2027_p0), %s1965_s7, 128, %s1963_s15, %s1144_s16  }
 0x948 PF: > { %s1169_s11 = sand.u32 1, %s1626_s18   ;;  %p2028_p7 = scmp.ne.s32.totalorder %s2018_s25, 0 }
 0x949   : > { %p2029_p9 = scmp.ge.s32.totalorder %s1638_s21, 2  ;;  %s1170_s28 = scalar_lea.sflag [#allocation5], %s1169_s11 }
 0x94b   : > { %p1402_p12 = pnand %p2029_p9, %p2028_p7 }
 0x94d   : > { %1621 = dma.done.wait (!%p1402_p12), %s1170_s28, 128  }
 0x94e   : > { %1623 = vsyncadd (!%p1402_p12), %s1170_s28, 4294967168  ;;  %p19_p2 = scmp.ge.s32.totalorder %s1803_s14, 4   ;;  %s2030_s18 = smov %s1630_s19 }
 0x94f   : > { %s2031_s19 = smov %s1634_s20  ;;  %s2032_s20 = smov %s1819_s27 }
 0x950   : > { %s2033_s21 = smov %s1803_s14  ;;  %21 = sbr.rel (!%p19_p2) target bundleno = 6 (0x6), region = 93 }
 0x957   :  { %1175 = vsyncpa [#allocation4], 1 }
 0x958   :  { %1177 = vsyncpa [#allocation4 + $0x1], 1 }
 0x959   :  { %1178 = vsyncpa [#allocation7], 1 }
 0x95a   :  { %1179 = vsyncpa [#allocation5], 1 }
 0x95b   :  { %1181 = vsyncpa [#allocation5 + $0x1], 1 }

</bundles_post_ra>
